<compile_context>
chip_gen: v6e
topology: v6e:2x2x1
jax: 0.10.0
libtpu: 0.0.40
codegen_flags: <defaults>
</compile_context>

<pallas_src>
import functools

import jax
import jax.numpy as jnp
from jax import lax
from jax.experimental import pallas as pl
from jax.experimental.pallas import tpu as pltpu


# --------------------------------------------------------------------------- #
# Kernel
# --------------------------------------------------------------------------- #
def lstm_block_kernel(x_ref, h0_ref, c0_ref, wih_ref, whh_ref, b_ref,
                      wout_ref, bout_ref,
                      out_ref, h_out_ref, c_out_ref,
                      gx_sc, h_all_sc, *, seq_len, padded_len):
    """Grid axis 0 = time block.  Weights resident in VMEM; h/c carried in the
    constant-index output refs across grid steps."""
    tb = pl.program_id(0)
    TB, Bp, Ip = x_ref.shape
    Hp = h_out_ref.shape[1]
    Op = out_ref.shape[2]

    @pl.when(tb == 0)
    def _init():
        h_out_ref[...] = h0_ref[...]
        c_out_ref[...] = c0_ref[...]

    # ---- batched (non-recurrent) input projection + bias, one MXU pass ------
    x_all = x_ref[...].reshape(TB * Bp, Ip)
    gx = jnp.dot(x_all.astype(wih_ref.dtype), wih_ref[...],
                 preferred_element_type=jnp.float32) + b_ref[...]
    gx_sc[...] = gx.reshape(TB, Bp, 4 * Hp)

    # ---- serial recurrence: only h @ W_hh + elementwise gates ---------------
    def step(t, carry):
        h, c = carry
        gates = gx_sc[t] + jnp.dot(h.astype(whh_ref.dtype), whh_ref[...],
                                   preferred_element_type=jnp.float32)
        # Gate slices are 128-lane aligned (Hp is a multiple of 128).
        i_g = jax.nn.sigmoid(gates[:, 0 * Hp:1 * Hp])
        f_g = jax.nn.sigmoid(gates[:, 1 * Hp:2 * Hp])
        g_g = jnp.tanh(gates[:, 2 * Hp:3 * Hp])
        o_g = jax.nn.sigmoid(gates[:, 3 * Hp:4 * Hp])
        c_new = f_g * c + i_g * g_g
        h_new = o_g * jnp.tanh(c_new)
        h_all_sc[t] = h_new
        if padded_len != seq_len:            # static: only when T % TB != 0
            valid = (tb * TB + t) < seq_len
            h_new = jnp.where(valid, h_new, h)
            c_new = jnp.where(valid, c_new, c)
        return h_new, c_new

    h_fin, c_fin = lax.fori_loop(0, TB, step,
                                 (h_out_ref[...], c_out_ref[...]),
                                 unroll=True)
    h_out_ref[...] = h_fin
    c_out_ref[...] = c_fin

    # ---- batched (non-recurrent) output head: Linear + LogSoftmax -----------
    h_all = h_all_sc[...].reshape(TB * Bp, Hp)
    logits = jnp.dot(h_all.astype(wout_ref.dtype), wout_ref[...],
                     preferred_element_type=jnp.float32) + bout_ref[...]
    m = jnp.max(logits, axis=1, keepdims=True)
    lse = jnp.log(jnp.sum(jnp.exp(logits - m), axis=1, keepdims=True)) + m
    out_ref[...] = (logits - lse).reshape(TB, Bp, Op)


# --------------------------------------------------------------------------- #
# Wrappers
# --------------------------------------------------------------------------- #
def _round_up(n, m):
    return ((n + m - 1) // m) * m


def rnn_lstm_forward_sequence(x_seq, hc, packed, time_block=16):
    """Run T LSTM steps in ONE pallas_call.  x_seq: (T, B, I).

    Returns (log_softmax outputs (T, B, O), (h_T, c_T)).
    Equivalent to calling RNN_LSTM.forward once per timestep.
    """
    h0, c0 = hc
    T, B, I = x_seq.shape
    H = h0.shape[1]
    I_l, H_l, O, Ip, Hp, Op = packed["dims"]
    assert (I, H) == (I_l, H_l)
    Bp = _round_up(B, 8)

    TB = max(1, min(time_block, T))
    T_pad = _round_up(T, TB)
    n_blocks = T_pad // TB

    # Pad activations / state to (8, 128)-friendly tiles only if needed
    # (zeros are exact here; pad timesteps are masked inside the kernel).
    if (T_pad, Bp, Ip) != (T, B, I):
        x_p = jnp.zeros((T_pad, Bp, Ip), jnp.float32).at[:T, :B, :I].set(x_seq)
    else:
        x_p = x_seq.astype(jnp.float32)
    if (Bp, Hp) != (B, H):
        h_p = jnp.zeros((Bp, Hp), jnp.float32).at[:B, :H].set(h0)
        c_p = jnp.zeros((Bp, Hp), jnp.float32).at[:B, :H].set(c0)
    else:
        h_p = h0.astype(jnp.float32)
        c_p = c0.astype(jnp.float32)

    # Real VMEM residency estimate (weights ×2 buffers, streamed x/out ×2,
    # state, scratch) with headroom; clamped to the smallest physical VMEM
    # across generations (64 MiB on v7x).
    wbytes = jnp.dtype(packed["w_ih"].dtype).itemsize
    weight_b = (Ip * 4 * Hp + Hp * 4 * Hp + Hp * Op) * wbytes + (4 * Hp + Op) * 4
    stream_b = 2 * TB * Bp * (Ip + Op) * 4
    state_b = 2 * 4 * Bp * Hp * 4
    scratch_b = TB * Bp * (4 * Hp + Hp) * 4
    total_b = 2 * weight_b + stream_b + state_b + scratch_b
    vmem_limit = int(min(max(2 * total_b, 16 * 1024 * 1024), 64 * 1024 * 1024))

    kernel = functools.partial(lstm_block_kernel, seq_len=T, padded_len=T_pad)

    out_p, hT_p, cT_p = pl.pallas_call(
        kernel,
        grid=(n_blocks,),
        in_specs=[
            pl.BlockSpec((TB, Bp, Ip), lambda tb: (tb, 0, 0)),     # x block (streamed)
            pl.BlockSpec((Bp, Hp), lambda tb: (0, 0)),             # h0 (resident)
            pl.BlockSpec((Bp, Hp), lambda tb: (0, 0)),             # c0 (resident)
            pl.BlockSpec((Ip, 4 * Hp), lambda tb: (0, 0)),         # W_ih^T (resident)
            pl.BlockSpec((Hp, 4 * Hp), lambda tb: (0, 0)),         # W_hh^T (resident)
            pl.BlockSpec((1, 4 * Hp), lambda tb: (0, 0)),          # fused bias
            pl.BlockSpec((Hp, Op), lambda tb: (0, 0)),             # W_out (resident)
            pl.BlockSpec((1, Op), lambda tb: (0, 0)),              # b_out
        ],
        out_specs=[
            pl.BlockSpec((TB, Bp, Op), lambda tb: (tb, 0, 0)),     # per-block outputs
            pl.BlockSpec((Bp, Hp), lambda tb: (0, 0)),             # final h (carry)
            pl.BlockSpec((Bp, Hp), lambda tb: (0, 0)),             # final c (carry)
        ],
        out_shape=(
            jax.ShapeDtypeStruct((T_pad, Bp, Op), jnp.float32),
            jax.ShapeDtypeStruct((Bp, Hp), jnp.float32),
            jax.ShapeDtypeStruct((Bp, Hp), jnp.float32),
        ),
        scratch_shapes=[
            pltpu.VMEM((TB, Bp, 4 * Hp), jnp.float32),   # hoisted x-projection
            pltpu.VMEM((TB, Bp, Hp), jnp.float32),       # per-step hidden states
        ],
        compiler_params=pltpu.CompilerParams(
            dimension_semantics=("arbitrary",),           # time is recurrent
            vmem_limit_bytes=vmem_limit,
        ),
    )(x_p, h_p, c_p, packed["w_ih"], packed["w_hh"], packed["bias"],
      packed["wout"], packed["bout"])

    return out_p[:T, :B, :O], (hT_p[:B, :H], cT_p[:B, :H])


def rnn_lstm_forward(x, hc, packed):
    """PyTorch RNN_LSTM.forward(input, hc) -> (output, (hidden, context))."""
    out_seq, hc_new = rnn_lstm_forward_sequence(x[None], hc, packed, time_block=1)
    return out_seq[0], hc_new


# --------------------------------------------------------------------------- #
# Parameters
# --------------------------------------------------------------------------- #
def init_params(key, input_size, hidden_size, output_size):
    """Logical (unpadded) params, PyTorch-default uniform init, pre-transposed."""
    ks = jax.random.split(key, 6)
    k = 1.0 / jnp.sqrt(hidden_size)
    wih_t = jax.random.uniform(ks[0], (input_size, 4 * hidden_size),
                               minval=-k, maxval=k, dtype=jnp.float32)
    whh_t = jax.random.uniform(ks[1], (hidden_size, 4 * hidden_size),
                               minval=-k, maxval=k, dtype=jnp.float32)
    b_ih = jax.random.uniform(ks[2], (1, 4 * hidden_size),
                              minval=-k, maxval=k, dtype=jnp.float32)
    b_hh = jax.random.uniform(ks[3], (1, 4 * hidden_size),
                              minval=-k, maxval=k, dtype=jnp.float32)
    wout_t = jax.random.uniform(ks[4], (hidden_size, output_size),
                                minval=-k, maxval=k, dtype=jnp.float32)
    bout = jax.random.uniform(ks[5], (1, output_size),
                              minval=-k, maxval=k, dtype=jnp.float32)
    return {"wih_t": wih_t, "whh_t": whh_t, "bias": b_ih + b_hh,
            "wout_t": wout_t, "bout": bout}


def pack_params(p, input_size, hidden_size, output_size,
                weight_dtype=jnp.bfloat16):
    """Pad weights to lane-aligned, MXU-friendly layouts.

    Default bf16 weights (MXU-native everywhere; f32 accumulation is kept in
    the kernel).  Pass weight_dtype=jnp.float32 for bit-tight f32 math.
    INVARIANTS: pad entries of W/bias must stay exactly 0; bout stays f32 with
    -1e30 in pad output columns (would not survive fp16).
    """
    I, H, O = input_size, hidden_size, output_size
    Ip, Hp, Op = _round_up(I, 128), _round_up(H, 128), _round_up(O, 128)

    w_ih = jnp.zeros((Ip, 4 * Hp), jnp.float32)
    w_hh = jnp.zeros((Hp, 4 * Hp), jnp.float32)
    bias = jnp.zeros((1, 4 * Hp), jnp.float32)
    for g in range(4):                           # PyTorch gate order [i, f, g, o]
        w_ih = w_ih.at[:I, g * Hp:g * Hp + H].set(p["wih_t"][:, g * H:(g + 1) * H])
        w_hh = w_hh.at[:H, g * Hp:g * Hp + H].set(p["whh_t"][:, g * H:(g + 1) * H])
        bias = bias.at[:, g * Hp:g * Hp + H].set(p["bias"][:, g * H:(g + 1) * H])

    wout = jnp.zeros((Hp, Op), jnp.float32).at[:H, :O].set(p["wout_t"])
    bout = jnp.full((1, Op), -1e30, jnp.float32).at[:, :O].set(p["bout"])

    return {"w_ih": w_ih.astype(weight_dtype),
            "w_hh": w_hh.astype(weight_dtype),
            "bias": bias,                                # f32
            "wout": wout.astype(weight_dtype),
            "bout": bout,                                # f32
            "dims": (I, H, O, Ip, Hp, Op)}


# --------------------------------------------------------------------------- #
# Pure-JAX reference (mirrors the PyTorch module exactly)
# --------------------------------------------------------------------------- #
def _reference_forward(x, hc, params):
    h0, c0 = hc
    H = h0.shape[1]
    gates = x @ params["wih_t"] + h0 @ params["whh_t"] + params["bias"]
    i = jax.nn.sigmoid(gates[:, 0 * H:1 * H])
    f = jax.nn.sigmoid(gates[:, 1 * H:2 * H])
    g = jnp.tanh(gates[:, 2 * H:3 * H])
    o = jax.nn.sigmoid(gates[:, 3 * H:4 * H])
    c_new = f * c0 + i * g
    h_new = o * jnp.tanh(c_new)
    logits = h_new @ params["wout_t"] + params["bout"]
    return jax.nn.log_softmax(logits, axis=1), (h_new, c_new)


def _reference_sequence(x_seq, hc, params):
    h, c = hc
    outs = []
    for t in range(x_seq.shape[0]):
        o, (h, c) = _reference_forward(x_seq[t], (h, c), params)
        outs.append(o)
    return jnp.stack(outs), (h, c)


# --------------------------------------------------------------------------- #
if __name__ == "__main__":
    B, INPUT, HIDDEN, OUTPUT, T = 2, 16, 32, 10, 8

    key = jax.random.PRNGKey(0)
    k_x, k_xs, k_p = jax.random.split(key, 3)

    params = init_params(k_p, INPUT, HIDDEN, OUTPUT)
    packed_f32 = pack_params(params, INPUT, HIDDEN, OUTPUT, weight_dtype=jnp.float32)
    packed_bf16 = pack_params(params, INPUT, HIDDEN, OUTPUT)       # default bf16

    x = jax.random.normal(k_x, (B, INPUT), dtype=jnp.float32)
    h0 = jnp.zeros((B, HIDDEN), dtype=jnp.float32)                 # initHidden()
    c0 = jnp.zeros((B, HIDDEN), dtype=jnp.float32)

    # ---- single-step forward, f32 weights (exact module semantics) ----------
    out, (h1, c1) = rnn_lstm_forward(x, (h0, c0), packed_f32)
    jax.block_until_ready((out, h1, c1))
    out_r, (h_r, c_r) = _reference_forward(x, (h0, c0), params)
    assert jnp.allclose(out, out_r, atol=1e-5), "log-softmax output mismatch"
    assert jnp.allclose(h1, h_r, atol=1e-5), "hidden state mismatch"
    assert jnp.allclose(c1, c_r, atol=1e-5), "cell state mismatch"

    # ---- whole sequence, time-blocked (TB=4 -> 2 grid blocks), f32 ----------
    x_seq = jax.random.normal(k_xs, (T, B, INPUT), dtype=jnp.float32)
    out_seq, (hT, cT) = rnn_lstm_forward_sequence(x_seq, (h0, c0), packed_f32,
                                                  time_block=4)
    jax.block_until_ready((out_seq, hT, cT))
    out_seq_r, (hT_r, cT_r) = _reference_sequence(x_seq, (h0, c0), params)
    assert jnp.allclose(out_seq, out_seq_r, atol=1e-4), "sequence output mismatch"
    assert jnp.allclose(hT, hT_r, atol=1e-4), "sequence hidden mismatch"
    assert jnp.allclose(cT, cT_r, atol=1e-4), "sequence cell mismatch"

    # ---- same sequence with default bf16 weights (looser tolerance) ---------
    out_bf, (hT_bf, cT_bf) = rnn_lstm_forward_sequence(x_seq, (h0, c0),
                                                       packed_bf16, time_block=4)
    jax.block_until_ready((out_bf, hT_bf, cT_bf))
    assert jnp.allclose(out_bf, out_seq_r, atol=5e-2), "bf16 output mismatch"
    assert jnp.allclose(hT_bf, hT_r, atol=5e-2), "bf16 hidden mismatch"
    assert jnp.allclose(cT_bf, cT_r, atol=5e-2), "bf16 cell mismatch"

    # ---- ragged T (T=6, TB=4 -> last 2 steps of the pad block masked) -------
    x_rag = x_seq[:6]
    out_rag, (h6, c6) = rnn_lstm_forward_sequence(x_rag, (h0, c0), packed_f32,
                                                  time_block=4)
    jax.block_until_ready((out_rag, h6, c6))
    out_rag_r, (h6_r, c6_r) = _reference_sequence(x_rag, (h0, c0), params)
    assert jnp.allclose(out_rag, out_rag_r, atol=1e-4), "ragged output mismatch"
    assert jnp.allclose(h6, h6_r, atol=1e-4), "ragged hidden mismatch"
    assert jnp.allclose(c6, c6_r, atol=1e-4), "ragged cell mismatch"

    print("KERNEL_OK")
</pallas_src>

<mosaic_0001>
module attributes {stable_mosaic.version = 11 : i64} {
  func.func @lstm_block_kernel(%arg0: i32, %arg1: memref<1x8x128xf32, #tpu.memory_space<vmem>>, %arg2: memref<8x128xf32, #tpu.memory_space<vmem>>, %arg3: memref<8x128xf32, #tpu.memory_space<vmem>>, %arg4: memref<128x512xf32, #tpu.memory_space<vmem>>, %arg5: memref<128x512xf32, #tpu.memory_space<vmem>>, %arg6: memref<1x512xf32, #tpu.memory_space<vmem>>, %arg7: memref<128x128xf32, #tpu.memory_space<vmem>>, %arg8: memref<1x128xf32, #tpu.memory_space<vmem>>, %arg9: memref<1x8x128xf32, #tpu.memory_space<vmem>>, %arg10: memref<8x128xf32, #tpu.memory_space<vmem>>, %arg11: memref<8x128xf32, #tpu.memory_space<vmem>>, %arg12: memref<1x8x512xf32, #tpu.memory_space<vmem>>, %arg13: memref<1x8x128xf32, #tpu.memory_space<vmem>>) attributes {dimension_semantics = [#tpu.dimension_semantics<arbitrary>], iteration_bounds = array<i64: 1>, scalar_prefetch = 0 : i64, scratch_operands = 2 : i64, tpu.core_type = #tpu.core_type<tc>, window_params = [{transform_indices = @transform_0, window_bounds = array<i64: 1, 8, 128>}, {pipeline_mode = #tpu.pipeline_mode<synchronous>, transform_indices = @transform_1, window_bounds = array<i64: 8, 128>}, {pipeline_mode = #tpu.pipeline_mode<synchronous>, transform_indices = @transform_2, window_bounds = array<i64: 8, 128>}, {pipeline_mode = #tpu.pipeline_mode<synchronous>, transform_indices = @transform_3, window_bounds = array<i64: 128, 512>}, {pipeline_mode = #tpu.pipeline_mode<synchronous>, transform_indices = @transform_4, window_bounds = array<i64: 128, 512>}, {pipeline_mode = #tpu.pipeline_mode<synchronous>, transform_indices = @transform_5, window_bounds = array<i64: 1, 512>}, {pipeline_mode = #tpu.pipeline_mode<synchronous>, transform_indices = @transform_6, window_bounds = array<i64: 128, 128>}, {pipeline_mode = #tpu.pipeline_mode<synchronous>, transform_indices = @transform_7, window_bounds = array<i64: 1, 128>}, {transform_indices = @transform_8, window_bounds = array<i64: 1, 8, 128>}, {pipeline_mode = #tpu.pipeline_mode<synchronous>, transform_indices = @transform_9, window_bounds = array<i64: 8, 128>}, {pipeline_mode = #tpu.pipeline_mode<synchronous>, transform_indices = @transform_10, window_bounds = array<i64: 8, 128>}]} {
    %c0_i32 = arith.constant 0 : i32
    %0 = arith.cmpi eq, %arg0, %c0_i32 : i32
    %1 = arith.extui %0 : i1 to i32
    %c0_i32_0 = arith.constant 0 : i32
    %2 = arith.cmpi ne, %1, %c0_i32_0 : i32
    scf.if %2 {
      %c0_42 = arith.constant 0 : index
      %c0_43 = arith.constant 0 : index
      %71 = vector.load %arg2[%c0_42, %c0_43] : memref<8x128xf32, #tpu.memory_space<vmem>>, vector<8x128xf32>
      %c0_44 = arith.constant 0 : index
      %c0_45 = arith.constant 0 : index
      %72 = vector.load %arg10[%c0_44, %c0_45] : memref<8x128xf32, #tpu.memory_space<vmem>>, vector<8x128xf32>
      tpu.vector_store %arg10[%c0_44, %c0_45], %71 {strides = array<i32>} : memref<8x128xf32, #tpu.memory_space<vmem>>, vector<8x128xf32>,
      %c0_46 = arith.constant 0 : index
      %c0_47 = arith.constant 0 : index
      %73 = vector.load %arg3[%c0_46, %c0_47] : memref<8x128xf32, #tpu.memory_space<vmem>>, vector<8x128xf32>
      %c0_48 = arith.constant 0 : index
      %c0_49 = arith.constant 0 : index
      %74 = vector.load %arg11[%c0_48, %c0_49] : memref<8x128xf32, #tpu.memory_space<vmem>>, vector<8x128xf32>
      tpu.vector_store %arg11[%c0_48, %c0_49], %73 {strides = array<i32>} : memref<8x128xf32, #tpu.memory_space<vmem>>, vector<8x128xf32>,
    } else {
    }
    %c0 = arith.constant 0 : index
    %c0_1 = arith.constant 0 : index
    %c0_2 = arith.constant 0 : index
    %3 = vector.load %arg1[%c0, %c0_1, %c0_2] : memref<1x8x128xf32, #tpu.memory_space<vmem>>, vector<1x8x128xf32>
    %4 = vector.shape_cast %3 : vector<1x8x128xf32> to vector<8x128xf32>
    %c0_3 = arith.constant 0 : index
    %c0_4 = arith.constant 0 : index
    %5 = vector.load %arg4[%c0_3, %c0_4] : memref<128x512xf32, #tpu.memory_space<vmem>>, vector<128x512xf32>
    %cst = arith.constant dense<0.000000e+00> : vector<8x512xf32>
    %6 = tpu.matmul %4, %5, %cst {dimension_numbers = #tpu.dot_dimension_numbers<[1], [0], [0], [1], [0, 0, 1, 1], [], []>} : vector<8x128xf32>, vector<128x512xf32>, vector<8x512xf32> -> vector<8x512xf32>
    %c0_5 = arith.constant 0 : index
    %c0_6 = arith.constant 0 : index
    %7 = vector.load %arg6[%c0_5, %c0_6] : memref<1x512xf32, #tpu.memory_space<vmem>>, vector<1x512xf32>
    %8 = vector.broadcast %7 : vector<1x512xf32> to vector<8x512xf32>
    %9 = arith.addf %6, %8 : vector<8x512xf32>
    %10 = vector.shape_cast %9 : vector<8x512xf32> to vector<1x8x512xf32>
    %c0_7 = arith.constant 0 : index
    %c0_8 = arith.constant 0 : index
    %c0_9 = arith.constant 0 : index
    %11 = vector.load %arg12[%c0_7, %c0_8, %c0_9] : memref<1x8x512xf32, #tpu.memory_space<vmem>>, vector<1x8x512xf32>
    tpu.vector_store %arg12[%c0_7, %c0_8, %c0_9], %10 {strides = array<i32>} : memref<1x8x512xf32, #tpu.memory_space<vmem>>, vector<1x8x512xf32>,
    %c0_10 = arith.constant 0 : index
    %c0_11 = arith.constant 0 : index
    %12 = vector.load %arg10[%c0_10, %c0_11] : memref<8x128xf32, #tpu.memory_space<vmem>>, vector<8x128xf32>
    %c0_12 = arith.constant 0 : index
    %c0_13 = arith.constant 0 : index
    %13 = vector.load %arg11[%c0_12, %c0_13] : memref<8x128xf32, #tpu.memory_space<vmem>>, vector<8x128xf32>
    %c0_i32_14 = arith.constant 0 : i32
    %14 = arith.index_cast %c0_i32_14 : i32 to index
    %c0_15 = arith.constant 0 : index
    %c0_16 = arith.constant 0 : index
    %15 = vector.load %arg12[%14, %c0_15, %c0_16] : memref<1x8x512xf32, #tpu.memory_space<vmem>>, vector<1x8x512xf32>
    %16 = vector.shape_cast %15 : vector<1x8x512xf32> to vector<8x512xf32>
    %c0_17 = arith.constant 0 : index
    %c0_18 = arith.constant 0 : index
    %17 = vector.load %arg5[%c0_17, %c0_18] : memref<128x512xf32, #tpu.memory_space<vmem>>, vector<128x512xf32>
    %cst_19 = arith.constant dense<0.000000e+00> : vector<8x512xf32>
    %18 = tpu.matmul %12, %17, %cst_19 {dimension_numbers = #tpu.dot_dimension_numbers<[1], [0], [0], [1], [0, 0, 1, 1], [], []>} : vector<8x128xf32>, vector<128x512xf32>, vector<8x512xf32> -> vector<8x512xf32>
    %19 = arith.addf %16, %18 : vector<8x512xf32>
    %20 = vector.extract_strided_slice %19 {offsets = [0, 0], sizes = [8, 128], strides = [1, 1]} : vector<8x512xf32> to vector<8x128xf32>
    %21 = arith.negf %20 : vector<8x128xf32>
    %22 = math.exp %21 : vector<8x128xf32>
    %cst_20 = arith.constant 1.000000e+00 : f32
    %23 = vector.broadcast %cst_20 : f32 to vector<8x128xf32>
    %24 = arith.addf %23, %22 : vector<8x128xf32>
    %25 = arith.divf %23, %24 : vector<8x128xf32>
    %26 = vector.extract_strided_slice %19 {offsets = [0, 128], sizes = [8, 128], strides = [1, 1]} : vector<8x512xf32> to vector<8x128xf32>
    %27 = arith.negf %26 : vector<8x128xf32>
    %28 = math.exp %27 : vector<8x128xf32>
    %cst_21 = arith.constant 1.000000e+00 : f32
    %29 = vector.broadcast %cst_21 : f32 to vector<8x128xf32>
    %30 = arith.addf %29, %28 : vector<8x128xf32>
    %31 = arith.divf %29, %30 : vector<8x128xf32>
    %32 = vector.extract_strided_slice %19 {offsets = [0, 256], sizes = [8, 128], strides = [1, 1]} : vector<8x512xf32> to vector<8x128xf32>
    %33 = math.tanh %32 : vector<8x128xf32>
    %34 = vector.extract_strided_slice %19 {offsets = [0, 384], sizes = [8, 128], strides = [1, 1]} : vector<8x512xf32> to vector<8x128xf32>
    %35 = arith.negf %34 : vector<8x128xf32>
    %36 = math.exp %35 : vector<8x128xf32>
    %cst_22 = arith.constant 1.000000e+00 : f32
    %37 = vector.broadcast %cst_22 : f32 to vector<8x128xf32>
    %38 = arith.addf %37, %36 : vector<8x128xf32>
    %39 = arith.divf %37, %38 : vector<8x128xf32>
    %40 = arith.mulf %31, %13 : vector<8x128xf32>
    %41 = arith.mulf %25, %33 : vector<8x128xf32>
    %42 = arith.addf %40, %41 : vector<8x128xf32>
    %43 = math.tanh %42 : vector<8x128xf32>
    %44 = arith.mulf %39, %43 : vector<8x128xf32>
    %45 = arith.index_cast %c0_i32_14 : i32 to index
    %c0_23 = arith.constant 0 : index
    %c0_24 = arith.constant 0 : index
    %46 = vector.load %arg13[%45, %c0_23, %c0_24] : memref<1x8x128xf32, #tpu.memory_space<vmem>>, vector<1x8x128xf32>
    %47 = vector.shape_cast %46 : vector<1x8x128xf32> to vector<8x128xf32>
    %48 = vector.shape_cast %44 : vector<8x128xf32> to vector<1x8x128xf32>
    tpu.vector_store %arg13[%45, %c0_23, %c0_24], %48 {strides = array<i32>} : memref<1x8x128xf32, #tpu.memory_space<vmem>>, vector<1x8x128xf32>,
    %c1_i32 = arith.constant 1 : i32
    %c0_25 = arith.constant 0 : index
    %c0_26 = arith.constant 0 : index
    %49 = vector.load %arg10[%c0_25, %c0_26] : memref<8x128xf32, #tpu.memory_space<vmem>>, vector<8x128xf32>
    tpu.vector_store %arg10[%c0_25, %c0_26], %44 {strides = array<i32>} : memref<8x128xf32, #tpu.memory_space<vmem>>, vector<8x128xf32>,
    %c0_27 = arith.constant 0 : index
    %c0_28 = arith.constant 0 : index
    %50 = vector.load %arg11[%c0_27, %c0_28] : memref<8x128xf32, #tpu.memory_space<vmem>>, vector<8x128xf32>
    tpu.vector_store %arg11[%c0_27, %c0_28], %42 {strides = array<i32>} : memref<8x128xf32, #tpu.memory_space<vmem>>, vector<8x128xf32>,
    %c0_29 = arith.constant 0 : index
    %c0_30 = arith.constant 0 : index
    %c0_31 = arith.constant 0 : index
    %51 = vector.load %arg13[%c0_29, %c0_30, %c0_31] : memref<1x8x128xf32, #tpu.memory_space<vmem>>, vector<1x8x128xf32>
    %52 = vector.shape_cast %51 : vector<1x8x128xf32> to vector<8x128xf32>
    %c0_32 = arith.constant 0 : index
    %c0_33 = arith.constant 0 : index
    %53 = vector.load %arg7[%c0_32, %c0_33] : memref<128x128xf32, #tpu.memory_space<vmem>>, vector<128x128xf32>
    %cst_34 = arith.constant dense<0.000000e+00> : vector<8x128xf32>
    %54 = tpu.matmul %52, %53, %cst_34 {dimension_numbers = #tpu.dot_dimension_numbers<[1], [0], [0], [1], [0, 0, 1, 1], [], []>} : vector<8x128xf32>, vector<128x128xf32>, vector<8x128xf32> -> vector<8x128xf32>
    %c0_35 = arith.constant 0 : index
    %c0_36 = arith.constant 0 : index
    %55 = vector.load %arg8[%c0_35, %c0_36] : memref<1x128xf32, #tpu.memory_space<vmem>>, vector<1x128xf32>
    %56 = vector.broadcast %55 : vector<1x128xf32> to vector<8x128xf32>
    %57 = arith.addf %54, %56 : vector<8x128xf32>
    %cst_37 = arith.constant dense<0xFF800000> : vector<8xf32>
    %58 = vector.multi_reduction <maximumf>, %57, %cst_37 [1] : vector<8x128xf32> to vector<8xf32>
    %59 = vector.shape_cast %58 : vector<8xf32> to vector<8x1xf32>
    %60 = vector.broadcast %59 : vector<8x1xf32> to vector<8x128xf32>
    %61 = arith.subf %57, %60 : vector<8x128xf32>
    %62 = math.exp %61 : vector<8x128xf32>
    %cst_38 = arith.constant dense<0.000000e+00> : vector<8xf32>
    %63 = vector.multi_reduction <add>, %62, %cst_38 [1] : vector<8x128xf32> to vector<8xf32>
    %64 = vector.shape_cast %63 : vector<8xf32> to vector<8x1xf32>
    %65 = math.log %64 : vector<8x1xf32>
    %66 = arith.addf %65, %59 : vector<8x1xf32>
    %67 = vector.broadcast %66 : vector<8x1xf32> to vector<8x128xf32>
    %68 = arith.subf %57, %67 : vector<8x128xf32>
    %69 = vector.shape_cast %68 : vector<8x128xf32> to vector<1x8x128xf32>
    %c0_39 = arith.constant 0 : index
    %c0_40 = arith.constant 0 : index
    %c0_41 = arith.constant 0 : index
    %70 = vector.load %arg9[%c0_39, %c0_40, %c0_41] : memref<1x8x128xf32, #tpu.memory_space<vmem>>, vector<1x8x128xf32>
    tpu.vector_store %arg9[%c0_39, %c0_40, %c0_41], %69 {strides = array<i32>} : memref<1x8x128xf32, #tpu.memory_space<vmem>>, vector<1x8x128xf32>,
    return
  }
  func.func @transform_0(%arg0: i32) -> (i32, i32, i32) {
    %c0_i32 = arith.constant 0 : i32
    %c0_i32_0 = arith.constant 0 : i32
    %c0_i32_1 = arith.constant 0 : i32
    return %arg0, %c0_i32, %c0_i32_0 : i32, i32, i32
  }
  func.func @transform_1(%arg0: i32) -> (i32, i32) {
    %c0_i32 = arith.constant 0 : i32
    %c0_i32_0 = arith.constant 0 : i32
    %c0_i32_1 = arith.constant 0 : i32
    return %c0_i32, %c0_i32_0 : i32, i32
  }
  func.func @transform_2(%arg0: i32) -> (i32, i32) {
    %c0_i32 = arith.constant 0 : i32
    %c0_i32_0 = arith.constant 0 : i32
    %c0_i32_1 = arith.constant 0 : i32
    return %c0_i32, %c0_i32_0 : i32, i32
  }
  func.func @transform_3(%arg0: i32) -> (i32, i32) {
    %c0_i32 = arith.constant 0 : i32
    %c0_i32_0 = arith.constant 0 : i32
    %c0_i32_1 = arith.constant 0 : i32
    return %c0_i32, %c0_i32_0 : i32, i32
  }
  func.func @transform_4(%arg0: i32) -> (i32, i32) {
    %c0_i32 = arith.constant 0 : i32
    %c0_i32_0 = arith.constant 0 : i32
    %c0_i32_1 = arith.constant 0 : i32
    return %c0_i32, %c0_i32_0 : i32, i32
  }
  func.func @transform_5(%arg0: i32) -> (i32, i32) {
    %c0_i32 = arith.constant 0 : i32
    %c0_i32_0 = arith.constant 0 : i32
    %c0_i32_1 = arith.constant 0 : i32
    return %c0_i32, %c0_i32_0 : i32, i32
  }
  func.func @transform_6(%arg0: i32) -> (i32, i32) {
    %c0_i32 = arith.constant 0 : i32
    %c0_i32_0 = arith.constant 0 : i32
    %c0_i32_1 = arith.constant 0 : i32
    return %c0_i32, %c0_i32_0 : i32, i32
  }
  func.func @transform_7(%arg0: i32) -> (i32, i32) {
    %c0_i32 = arith.constant 0 : i32
    %c0_i32_0 = arith.constant 0 : i32
    %c0_i32_1 = arith.constant 0 : i32
    return %c0_i32, %c0_i32_0 : i32, i32
  }
  func.func @transform_8(%arg0: i32) -> (i32, i32, i32) {
    %c0_i32 = arith.constant 0 : i32
    %c0_i32_0 = arith.constant 0 : i32
    %c0_i32_1 = arith.constant 0 : i32
    return %arg0, %c0_i32, %c0_i32_0 : i32, i32, i32
  }
  func.func @transform_9(%arg0: i32) -> (i32, i32) {
    %c0_i32 = arith.constant 0 : i32
    %c0_i32_0 = arith.constant 0 : i32
    %c0_i32_1 = arith.constant 0 : i32
    return %c0_i32, %c0_i32_0 : i32, i32
  }
  func.func @transform_10(%arg0: i32) -> (i32, i32) {
    %c0_i32 = arith.constant 0 : i32
    %c0_i32_0 = arith.constant 0 : i32
    %c0_i32_1 = arith.constant 0 : i32
    return %c0_i32, %c0_i32_0 : i32, i32
  }
}

</mosaic_0001>

<bundles_post_ra>
// kernel: tpu_custom_call.1
= control target key start
LH: loop header
LB: loop body
LE: loop exit
PB: predicated region body
PF: predicated region fallthrough
CT: control target
= control target key end

     0   :  { %16 = vsyncpa [#allocation5], 0  ;;  %s1158_s0 = inlined_call_operand.hbm [shape: f32[1,8,128], index: 0, kind: input, shape index: {}]   ;;  %s1159_s1 = inlined_call_operand.hbm [shape: f32[8,128], index: 1, kind: input, shape index: {}]   ;;  %s1160_s2 = inlined_call_operand.hbm [shape: f32[8,128], index: 2, kind: input, shape index: {}]   ;;  %s1161_s3 = inlined_call_operand.hbm [shape: f32[128,512], index: 3, kind: input, shape index: {}]   ;;  %s1162_s4 = inlined_call_operand.hbm [shape: f32[128,512], index: 4, kind: input, shape index: {}]   ;;  %s1163_s5 = inlined_call_operand.vmem [shape: f32[1,512], index: 5, kind: input, shape index: {}]   ;;  %s1164_s6 = inlined_call_operand.hbm [shape: f32[128,128], index: 6, kind: input, shape index: {}]   ;;  %s1165_s7 = inlined_call_operand.vmem [shape: f32[1,128], index: 7, kind: input, shape index: {}]   ;;  %s1166_s8 = inlined_call_operand.hbm [shape: f32[1,8,128], index: 8, kind: output, shape index: {0}]   ;;  %s1167_s9 = inlined_call_operand.hbm [shape: f32[8,128], index: 9, kind: output, shape index: {1}]   ;;  %s1168_s10 = inlined_call_operand.hbm [shape: f32[8,128], index: 10, kind: output, shape index: {2}]  }
   0x1   :  { %17 = vsyncpa [#allocation8], 0 }
   0x2   :  { %18 = vsyncpa [#allocation11], 0 }
   0x3   :  { %19 = vsyncpa [#allocation14], 0 }
   0x4   :  { %20 = vsyncpa [#allocation6], 0 }
   0x5   :  { %21 = vsyncpa [#allocation17], 0  ;;  %s1028_s13 = smov [#allocation7]   ;;  %s1029_s15 = smov [#allocation10]  }
   0x6   :  { %s38_s14 = sshll.u32 %s1028_s13, 4  ;;  %s57_s16 = sshll.u32 %s1029_s15, 4  ;;  %s39_s14 = int_to_ptr.vmem [resolvable:$true] %s38_s14  ;;  %s58_s16 = int_to_ptr.vmem [resolvable:$true] %s57_s16 }
   0x7   :  { %s844_s17 = scalar_lea.vmem %s39_s14, 128  ;;  %p849_p1 = scmp.lt.s32.totalorder %s39_s14, %s39_s14 }
   0x8   :  { %p845_p0 = scmp.ne.s32.totalorder %s39_s14, %s844_s17  ;;  %p850_p2 = scmp.lt.s32.totalorder %s844_s17, %s844_s17 }
   0xa   :  { %p851_p3 = por %p850_p2, %p849_p1 }
   0xc   :  { %p852_p4 = pnand %p851_p3, %p845_p0 }
   0xe   :  { %855 = shalt.err (!%p852_p4)
}
   0xf   :  { %41 = dma.hbm_to_vmem [thread:$0]  %s1159_s1, 128, %s39_s14, [#allocation8]  }
  0x10   :  { %s864_s20 = scalar_lea.vmem %s58_s16, 8192  ;;  %p869_p6 = scmp.lt.s32.totalorder %s58_s16, %s58_s16 }
  0x11   :  { %p865_p5 = scmp.ne.s32.totalorder %s58_s16, %s864_s20  ;;  %p870_p7 = scmp.lt.s32.totalorder %s864_s20, %s864_s20 }
  0x13   :  { %p871_p8 = por %p870_p7, %p869_p6 }
  0x15   :  { %p872_p9 = pnand %p871_p8, %p865_p5 }
  0x17   :  { %875 = shalt.err (!%p872_p9)
}
  0x18   :  { %s1030_s21 = smov 512   ;;  %s1031_s22 = smov 32  }
  0x19   :  { %63 = dma.hbm_to_vmem [thread:$0]  %s1161_s3, 8192, %s58_s16, [#allocation11], %s1030_s21, %s1030_s21, %s1031_s22  }
  0x1a   :  { %s1032_s25 = smov [#allocation4]   ;;  %s1033_s27 = smov [#allocation9]  }
  0x1b   :  { %s28_s26 = sshll.u32 %s1032_s25, 4  ;;  %s48_s1 = sshll.u32 %s1033_s27, 4  ;;  %s29_s26 = int_to_ptr.vmem [resolvable:$true] %s28_s26  ;;  %s49_s1 = int_to_ptr.vmem [resolvable:$true] %s48_s1 }
  0x1c   :  { %s884_s28 = scalar_lea.vmem %s29_s26, 128  ;;  %p889_p11 = scmp.lt.s32.totalorder %s29_s26, %s29_s26 }
  0x1d   :  { %p885_p10 = scmp.ne.s32.totalorder %s29_s26, %s884_s28  ;;  %p890_p12 = scmp.lt.s32.totalorder %s884_s28, %s884_s28 }
  0x1f   :  { %p891_p13 = por %p890_p12, %p889_p11 }
  0x21   :  { %p892_p0 = pnand %p891_p13, %p885_p10 }
  0x23   :  { %895 = shalt.err (!%p892_p0)
}
  0x24   :  { %31 = dma.hbm_to_vmem [thread:$0]  %s1158_s0, 128, %s29_s26, [#allocation5]  }
  0x25   :  { %s904_s11 = scalar_lea.vmem %s49_s1, 128  ;;  %p909_p2 = scmp.lt.s32.totalorder %s49_s1, %s49_s1 }
  0x26   :  { %p905_p1 = scmp.ne.s32.totalorder %s49_s1, %s904_s11  ;;  %p910_p3 = scmp.lt.s32.totalorder %s904_s11, %s904_s11 }
  0x28   :  { %p911_p4 = por %p910_p3, %p909_p2 }
  0x2a   :  { %p912_p5 = pnand %p911_p4, %p905_p1 }
  0x2c   :  { %915 = shalt.err (!%p912_p5)
}
  0x2d   :  { %51 = dma.hbm_to_vmem [thread:$0]  %s1160_s2, 128, %s49_s1, [#allocation8]  }
  0x2e   :  { %s1034_s13 = smov [#allocation12]   ;;  %s1035_s15 = smov [#allocation13]  }
  0x2f   :  { %s69_s14 = sshll.u32 %s1034_s13, 4  ;;  %s83_s16 = sshll.u32 %s1035_s15, 4  ;;  %s70_s14 = int_to_ptr.vmem [resolvable:$true] %s69_s14  ;;  %s84_s16 = int_to_ptr.vmem [resolvable:$true] %s83_s16 }
  0x30   :  { %s924_s17 = scalar_lea.vmem %s70_s14, 8192  ;;  %p929_p7 = scmp.lt.s32.totalorder %s70_s14, %s70_s14 }
  0x31   :  { %p925_p6 = scmp.ne.s32.totalorder %s70_s14, %s924_s17  ;;  %p930_p8 = scmp.lt.s32.totalorder %s924_s17, %s924_s17 }
  0x33   :  { %p931_p9 = por %p930_p8, %p929_p7 }
  0x35   :  { %p932_p10 = pnand %p931_p9, %p925_p6 }
  0x37   :  { %935 = shalt.err (!%p932_p10)
}
  0x38   :  { %75 = dma.hbm_to_vmem [thread:$0]  %s1162_s4, 8192, %s70_s14, [#allocation11], %s1030_s21, %s1030_s21, %s1031_s22  }
  0x39   :  { %s944_s2 = scalar_lea.vmem %s84_s16, 2048  ;;  %p949_p12 = scmp.lt.s32.totalorder %s84_s16, %s84_s16 }
  0x3a   :  { %p945_p11 = scmp.ne.s32.totalorder %s84_s16, %s944_s2  ;;  %p950_p13 = scmp.lt.s32.totalorder %s944_s2, %s944_s2 }
  0x3c   :  { %p951_p0 = por %p950_p13, %p949_p12 }
  0x3e   :  { %p952_p1 = pnand %p951_p0, %p945_p11 }
  0x40   :  { %955 = shalt.err (!%p952_p1)
}
  0x41   :  { %s1036_s19 = smov 128   ;;  %s1037_s20 = smov 8  }
  0x42   :  { %89 = dma.hbm_to_vmem [thread:$0]  %s1164_s6, 2048, %s84_s16, [#allocation14], %s1036_s19, %s1036_s19, %s1037_s20  }
  0x43   :  { %1016 = dma.done.wait [#allocation5], 128  }
  0x44   :  { %1017 = vsyncadd [#allocation5], 4294967168 }
  0x45   :  { %1018 = dma.done.wait [#allocation8], 256  }
  0x46   :  { %1019 = vsyncadd [#allocation8], 4294967040 }
  0x47   :  { %1020 = dma.done.wait [#allocation11], 16384  }
  0x48   :  { %1021 = vsyncadd [#allocation11], 4294950912 }
  0x49   :  { %1022 = dma.done.wait [#allocation14], 2048  }
  0x4a   :  { %1023 = vsyncadd [#allocation14], 4294965248  ;;  %v1038_v0 = vmov 0.0   ;;  %v180_v1 = vld [vmem:[#allocation10 + $0x1e8] sm:$0xff]  ;;  %v182_v2 = vld [vmem:[#allocation10 + $0x1f8] sm:$0xff]  ;;  %vm1039_vm0 = vmmov 0  }
  0x4b   :  { %269 = vmatprep.mubr.f32.mxu0 %v1038_v0  ;;  %340 = vmatprep.mubr.f32.mxu1 %v1038_v0  ;;  %v179_v3 = vld [vmem:[#allocation10 + $0x1e0] sm:$0xff]  ;;  %v181_v4 = vld [vmem:[#allocation10 + $0x1f0] sm:$0xff]  ;;  %v176_v5 = vld [vmem:[#allocation10 + $0x1c8] sm:$0xff]  ;;  %s1040_s22 = smov [#allocation16]  }
  0x4c   :  { %205 = vmatprep.subr.mxu0 %v180_v1  ;;  %276 = vmatprep.subr.mxu1 %v182_v2  ;;  %v178_v6 = vld [vmem:[#allocation10 + $0x1d8] sm:$0xff]  ;;  %v175_v7 = vld [vmem:[#allocation10 + $0x1c0] sm:$0xff]  ;;  %v177_v8 = vld [vmem:[#allocation10 + $0x1d0] sm:$0xff]  ;;  %s716_s25 = sshll.u32 %s1040_s22, 4  ;;  %s717_s25 = int_to_ptr.vmem [resolvable:$true] %s716_s25 }
  0x4d   :  { %206 = vmatpush1.msra.mxu0 %v179_v3  ;;  %277 = vmatpush1.msra.mxu1 %v181_v4  ;;  %v172_v9 = vld [vmem:[#allocation10 + $0x1a8] sm:$0xff]  ;;  %v174_v10 = vld [vmem:[#allocation10 + $0x1b8] sm:$0xff]  ;;  %v171_v11 = vld [vmem:[#allocation10 + $0x1a0] sm:$0xff]  ;;  %s956_s26 = scalar_lea.vmem %s717_s25, 128  ;;  %p961_p3 = scmp.lt.s32.totalorder %s717_s25, %s717_s25 }
  0x4e   :  { %207 = vmatprep.subr.mxu0 %v176_v5  ;;  %278 = vmatprep.subr.mxu1 %v178_v6  ;;  %v173_v12 = vld [vmem:[#allocation10 + $0x1b0] sm:$0xff]  ;;  %v168_v13 = vld [vmem:[#allocation10 + $0x188] sm:$0xff]  ;;  %v170_v14 = vld [vmem:[#allocation10 + $0x198] sm:$0xff]  ;;  %p957_p2 = scmp.ne.s32.totalorder %s717_s25, %s956_s26  ;;  %p962_p4 = scmp.lt.s32.totalorder %s956_s26, %s956_s26 }
  0x4f   :  { %208 = vmatpush1.msra.mxu0 %v175_v7  ;;  %279 = vmatpush1.msra.mxu1 %v177_v8  ;;  %v167_v15 = vld [vmem:[#allocation10 + $0x180] sm:$0xff]  ;;  %v169_v16 = vld [vmem:[#allocation10 + $0x190] sm:$0xff]  ;;  %v164_v17 = vld [vmem:[#allocation10 + $0x168] sm:$0xff] }
  0x50   :  { %209 = vmatprep.subr.mxu0 %v172_v9  ;;  %280 = vmatprep.subr.mxu1 %v174_v10  ;;  %v166_v18 = vld [vmem:[#allocation10 + $0x178] sm:$0xff]  ;;  %v163_v19 = vld [vmem:[#allocation10 + $0x160] sm:$0xff]  ;;  %v165_v20 = vld [vmem:[#allocation10 + $0x170] sm:$0xff]  ;;  %p963_p5 = por %p962_p4, %p961_p3 }
  0x51   :  { %210 = vmatpush1.msra.mxu0 %v171_v11  ;;  %281 = vmatpush1.msra.mxu1 %v173_v12  ;;  %v160_v21 = vld [vmem:[#allocation10 + $0x148] sm:$0xff]  ;;  %v162_v22 = vld [vmem:[#allocation10 + $0x158] sm:$0xff]  ;;  %v159_v23 = vld [vmem:[#allocation10 + $0x140] sm:$0xff] }
  0x52   :  { %211 = vmatprep.subr.mxu0 %v168_v13  ;;  %282 = vmatprep.subr.mxu1 %v170_v14  ;;  %v161_v24 = vld [vmem:[#allocation10 + $0x150] sm:$0xff]  ;;  %v156_v25 = vld [vmem:[#allocation10 + $0x128] sm:$0xff]  ;;  %v158_v26 = vld [vmem:[#allocation10 + $0x138] sm:$0xff]  ;;  %p964_p6 = pnand %p963_p5, %p957_p2 }
  0x53   :  { %212 = vmatpush1.msra.mxu0 %v167_v15  ;;  %283 = vmatpush1.msra.mxu1 %v169_v16  ;;  %v155_v27 = vld [vmem:[#allocation10 + $0x120] sm:$0xff]  ;;  %v157_v28 = vld [vmem:[#allocation10 + $0x130] sm:$0xff]  ;;  %v152_v29 = vld [vmem:[#allocation10 + $0x108] sm:$0xff] }
  0x54   :  { %213 = vmatprep.subr.mxu0 %v164_v17  ;;  %284 = vmatprep.subr.mxu1 %v166_v18  ;;  %v154_v30 = vld [vmem:[#allocation10 + $0x118] sm:$0xff]  ;;  %v151_v31 = vld [vmem:[#allocation10 + $0x100] sm:$0xff]  ;;  %v153_v32 = vld [vmem:[#allocation10 + $0x110] sm:$0xff] }
  0x55   :  { %214 = vmatpush1.msra.mxu0 %v163_v19  ;;  %285 = vmatpush1.msra.mxu1 %v165_v20  ;;  %v148_v33 = vld [vmem:[#allocation10 + $0xe8] sm:$0xff]  ;;  %v150_v34 = vld [vmem:[#allocation10 + $0xf8] sm:$0xff]  ;;  %v147_v35 = vld [vmem:[#allocation10 + $0xe0] sm:$0xff] }
  0x56   :  { %215 = vmatprep.subr.mxu0 %v160_v21  ;;  %286 = vmatprep.subr.mxu1 %v162_v22  ;;  %v149_v36 = vld [vmem:[#allocation10 + $0xf0] sm:$0xff]  ;;  %v144_v37 = vld [vmem:[#allocation10 + $0xc8] sm:$0xff]  ;;  %v146_v38 = vld [vmem:[#allocation10 + $0xd8] sm:$0xff] }
  0x57   :  { %216 = vmatpush1.msra.mxu0 %v159_v23  ;;  %287 = vmatpush1.msra.mxu1 %v161_v24  ;;  %v143_v39 = vld [vmem:[#allocation10 + $0xc0] sm:$0xff]  ;;  %v145_v40 = vld [vmem:[#allocation10 + $0xd0] sm:$0xff]  ;;  %v140_v41 = vld [vmem:[#allocation10 + $0xa8] sm:$0xff] }
  0x58   :  { %217 = vmatprep.subr.mxu0 %v156_v25  ;;  %288 = vmatprep.subr.mxu1 %v158_v26  ;;  %v142_v42 = vld [vmem:[#allocation10 + $0xb8] sm:$0xff]  ;;  %v139_v43 = vld [vmem:[#allocation10 + $0xa0] sm:$0xff]  ;;  %v141_v44 = vld [vmem:[#allocation10 + $0xb0] sm:$0xff] }
  0x59   :  { %218 = vmatpush1.msra.mxu0 %v155_v27  ;;  %289 = vmatpush1.msra.mxu1 %v157_v28  ;;  %v136_v45 = vld [vmem:[#allocation10 + $0x88] sm:$0xff]  ;;  %v138_v46 = vld [vmem:[#allocation10 + $0x98] sm:$0xff]  ;;  %v135_v47 = vld [vmem:[#allocation10 + $0x80] sm:$0xff] }
  0x5a   :  { %219 = vmatprep.subr.mxu0 %v152_v29  ;;  %290 = vmatprep.subr.mxu1 %v154_v30  ;;  %v137_v48 = vld [vmem:[#allocation10 + $0x90] sm:$0xff]  ;;  %v132_v49 = vld [vmem:[#allocation10 + $0x68] sm:$0xff]  ;;  %v134_v50 = vld [vmem:[#allocation10 + $0x78] sm:$0xff] }
  0x5b   :  { %220 = vmatpush1.msra.mxu0 %v151_v31  ;;  %291 = vmatpush1.msra.mxu1 %v153_v32  ;;  %v131_v51 = vld [vmem:[#allocation10 + $0x60] sm:$0xff]  ;;  %v133_v52 = vld [vmem:[#allocation10 + $0x70] sm:$0xff]  ;;  %v128_v53 = vld [vmem:[#allocation10 + $0x48] sm:$0xff] }
  0x5c   :  { %221 = vmatprep.subr.mxu0 %v148_v33  ;;  %292 = vmatprep.subr.mxu1 %v150_v34  ;;  %v130_v54 = vld [vmem:[#allocation10 + $0x58] sm:$0xff]  ;;  %v127_v55 = vld [vmem:[#allocation10 + $0x40] sm:$0xff]  ;;  %v129_v56 = vld [vmem:[#allocation10 + $0x50] sm:$0xff] }
  0x5d   :  { %222 = vmatpush1.msra.mxu0 %v147_v35  ;;  %293 = vmatpush1.msra.mxu1 %v149_v36  ;;  %v124_v57 = vld [vmem:[#allocation10 + $0x28] sm:$0xff]  ;;  %v126_v58 = vld [vmem:[#allocation10 + $0x38] sm:$0xff]  ;;  %v123_v59 = vld [vmem:[#allocation10 + $0x20] sm:$0xff] }
  0x5e   :  { %223 = vmatprep.subr.mxu0 %v144_v37  ;;  %294 = vmatprep.subr.mxu1 %v146_v38  ;;  %v125_v60 = vld [vmem:[#allocation10 + $0x30] sm:$0xff]  ;;  %v120_v61 = vld [vmem:[#allocation10 + $0x8] sm:$0xff]  ;;  %v122_v62 = vld [vmem:[#allocation10 + $0x18] sm:$0xff] }
  0x5f   :  { %224 = vmatpush1.msra.mxu0 %v143_v39  ;;  %295 = vmatpush1.msra.mxu1 %v145_v40  ;;  %v119_v63 = vld [vmem:[#allocation10] sm:$0xff]  ;;  %v121_v1 = vld [vmem:[#allocation10 + $0x10] sm:$0xff]  ;;  %v118_v2 = vld [vmem:[#allocation4] sm:$0xff] }
  0x60   :  { %225 = vmatprep.subr.mxu0 %v140_v41  ;;  %296 = vmatprep.subr.mxu1 %v142_v42  ;;  %v418_v3 = vld [vmem:[#allocation12 + $0x1e8] sm:$0xff]  ;;  %v420_v4 = vld [vmem:[#allocation12 + $0x1f8] sm:$0xff]  ;;  %v417_v5 = vld [vmem:[#allocation12 + $0x1e0] sm:$0xff] }
  0x61   :  { %226 = vmatpush1.msra.mxu0 %v139_v43  ;;  %297 = vmatpush1.msra.mxu1 %v141_v44  ;;  %v419_v6 = vld [vmem:[#allocation12 + $0x1f0] sm:$0xff]  ;;  %v414_v7 = vld [vmem:[#allocation12 + $0x1c8] sm:$0xff]  ;;  %v416_v8 = vld [vmem:[#allocation12 + $0x1d8] sm:$0xff] }
  0x62   :  { %227 = vmatprep.subr.mxu0 %v136_v45  ;;  %298 = vmatprep.subr.mxu1 %v138_v46  ;;  %v413_v9 = vld [vmem:[#allocation12 + $0x1c0] sm:$0xff]  ;;  %v415_v10 = vld [vmem:[#allocation12 + $0x1d0] sm:$0xff]  ;;  %v410_v11 = vld [vmem:[#allocation12 + $0x1a8] sm:$0xff] }
  0x63   :  { %228 = vmatpush1.msra.mxu0 %v135_v47  ;;  %299 = vmatpush1.msra.mxu1 %v137_v48  ;;  %v412_v12 = vld [vmem:[#allocation12 + $0x1b8] sm:$0xff]  ;;  %v409_v13 = vld [vmem:[#allocation12 + $0x1a0] sm:$0xff]  ;;  %v411_v14 = vld [vmem:[#allocation12 + $0x1b0] sm:$0xff] }
  0x64   :  { %229 = vmatprep.subr.mxu0 %v132_v49  ;;  %300 = vmatprep.subr.mxu1 %v134_v50  ;;  %v406_v15 = vld [vmem:[#allocation12 + $0x188] sm:$0xff]  ;;  %v408_v16 = vld [vmem:[#allocation12 + $0x198] sm:$0xff]  ;;  %v405_v17 = vld [vmem:[#allocation12 + $0x180] sm:$0xff] }
  0x65   :  { %230 = vmatpush1.msra.mxu0 %v131_v51  ;;  %301 = vmatpush1.msra.mxu1 %v133_v52  ;;  %v407_v18 = vld [vmem:[#allocation12 + $0x190] sm:$0xff]  ;;  %v402_v19 = vld [vmem:[#allocation12 + $0x168] sm:$0xff]  ;;  %v404_v20 = vld [vmem:[#allocation12 + $0x178] sm:$0xff] }
  0x66   :  { %231 = vmatprep.subr.mxu0 %v128_v53  ;;  %302 = vmatprep.subr.mxu1 %v130_v54  ;;  %v401_v21 = vld [vmem:[#allocation12 + $0x160] sm:$0xff]  ;;  %v403_v22 = vld [vmem:[#allocation12 + $0x170] sm:$0xff]  ;;  %v398_v23 = vld [vmem:[#allocation12 + $0x148] sm:$0xff] }
  0x67   :  { %232 = vmatpush1.msra.mxu0 %v127_v55  ;;  %303 = vmatpush1.msra.mxu1 %v129_v56  ;;  %v400_v24 = vld [vmem:[#allocation12 + $0x158] sm:$0xff]  ;;  %v397_v25 = vld [vmem:[#allocation12 + $0x140] sm:$0xff]  ;;  %v399_v26 = vld [vmem:[#allocation12 + $0x150] sm:$0xff] }
  0x68   :  { %233 = vmatprep.subr.mxu0 %v124_v57  ;;  %304 = vmatprep.subr.mxu1 %v126_v58  ;;  %v394_v27 = vld [vmem:[#allocation12 + $0x128] sm:$0xff]  ;;  %v396_v28 = vld [vmem:[#allocation12 + $0x138] sm:$0xff]  ;;  %v393_v29 = vld [vmem:[#allocation12 + $0x120] sm:$0xff] }
  0x69   :  { %234 = vmatpush1.msra.mxu0 %v123_v59  ;;  %305 = vmatpush1.msra.mxu1 %v125_v60  ;;  %v395_v30 = vld [vmem:[#allocation12 + $0x130] sm:$0xff]  ;;  %v390_v31 = vld [vmem:[#allocation12 + $0x108] sm:$0xff]  ;;  %v392_v32 = vld [vmem:[#allocation12 + $0x118] sm:$0xff] }
  0x6a   :  { %235 = vmatprep.subr.mxu0 %v120_v61  ;;  %306 = vmatprep.subr.mxu1 %v122_v62  ;;  %v389_v33 = vld [vmem:[#allocation12 + $0x100] sm:$0xff]  ;;  %v391_v34 = vld [vmem:[#allocation12 + $0x110] sm:$0xff]  ;;  %v386_v35 = vld [vmem:[#allocation12 + $0xe8] sm:$0xff] }
  0x6b   :  { %236 = vmatpush1.msra.mxu0 %v119_v63  ;;  %307 = vmatpush1.msra.mxu1 %v121_v1  ;;  %v388_v36 = vld [vmem:[#allocation12 + $0xf8] sm:$0xff]  ;;  %v385_v37 = vld [vmem:[#allocation12 + $0xe0] sm:$0xff]  ;;  %v387_v38 = vld [vmem:[#allocation12 + $0xf0] sm:$0xff] }
  0x6c   :  { %270 = vmatmul.mubr.f32.vlgmr.msra.gmra.mxu0 %v118_v2  ;;  %421 = vmatprep.subr.mxu0 %v418_v3  ;;  %v382_v39 = vld [vmem:[#allocation12 + $0xc8] sm:$0xff]  ;;  %v384_v40 = vld [vmem:[#allocation12 + $0xd8] sm:$0xff]  ;;  %v381_v41 = vld [vmem:[#allocation12 + $0xc0] sm:$0xff] }
  0x6d   :  { %492 = vmatprep.subr.mxu1 %v420_v4  ;;  %341 = vmatmul.mubr.f32.vlgmr.msra.gmra.mxu1 %v118_v2  ;;  %v383_v42 = vld [vmem:[#allocation12 + $0xd0] sm:$0xff]  ;;  %v378_v43 = vld [vmem:[#allocation12 + $0xa8] sm:$0xff]  ;;  %v380_v44 = vld [vmem:[#allocation12 + $0xb8] sm:$0xff] }
  0x6e   :  { %422 = vmatpush1.msra.mxu0 %v417_v5  ;;  %493 = vmatpush1.msra.mxu1 %v419_v6  ;;  %v377_v45 = vld [vmem:[#allocation12 + $0xa0] sm:$0xff]  ;;  %v379_v46 = vld [vmem:[#allocation12 + $0xb0] sm:$0xff]  ;;  %v374_v47 = vld [vmem:[#allocation12 + $0x88] sm:$0xff] }
  0x6f   :  { %423 = vmatprep.subr.mxu0 %v414_v7  ;;  %494 = vmatprep.subr.mxu1 %v416_v8  ;;  %v376_v48 = vld [vmem:[#allocation12 + $0x98] sm:$0xff]  ;;  %v373_v49 = vld [vmem:[#allocation12 + $0x80] sm:$0xff]  ;;  %v375_v50 = vld [vmem:[#allocation12 + $0x90] sm:$0xff] }
  0x70   :  { %424 = vmatpush1.msra.mxu0 %v413_v9  ;;  %495 = vmatpush1.msra.mxu1 %v415_v10  ;;  %v370_v51 = vld [vmem:[#allocation12 + $0x68] sm:$0xff]  ;;  %v372_v52 = vld [vmem:[#allocation12 + $0x78] sm:$0xff]  ;;  %v369_v53 = vld [vmem:[#allocation12 + $0x60] sm:$0xff] }
  0x71   :  { %425 = vmatprep.subr.mxu0 %v410_v11  ;;  %496 = vmatprep.subr.mxu1 %v412_v12  ;;  %v371_v54 = vld [vmem:[#allocation12 + $0x70] sm:$0xff]  ;;  %v366_v55 = vld [vmem:[#allocation12 + $0x48] sm:$0xff]  ;;  %v368_v56 = vld [vmem:[#allocation12 + $0x58] sm:$0xff] }
  0x72   :  { %426 = vmatpush1.msra.mxu0 %v409_v13  ;;  %497 = vmatpush1.msra.mxu1 %v411_v14  ;;  %v365_v57 = vld [vmem:[#allocation12 + $0x40] sm:$0xff]  ;;  %v367_v58 = vld [vmem:[#allocation12 + $0x50] sm:$0xff]  ;;  %v362_v59 = vld [vmem:[#allocation12 + $0x28] sm:$0xff] }
  0x73   :  { %427 = vmatprep.subr.mxu0 %v406_v15  ;;  %498 = vmatprep.subr.mxu1 %v408_v16  ;;  %v364_v60 = vld [vmem:[#allocation12 + $0x38] sm:$0xff]  ;;  %v361_v61 = vld [vmem:[#allocation12 + $0x20] sm:$0xff]  ;;  %v363_v62 = vld [vmem:[#allocation12 + $0x30] sm:$0xff] }
  0x74   :  { %428 = vmatpush1.msra.mxu0 %v405_v17  ;;  %499 = vmatpush1.msra.mxu1 %v407_v18  ;;  %v358_v63 = vld [vmem:[#allocation12 + $0x8] sm:$0xff]  ;;  %v360_v1 = vld [vmem:[#allocation12 + $0x18] sm:$0xff]  ;;  %v357_v2 = vld [vmem:[#allocation12] sm:$0xff] }
  0x75   :  { %429 = vmatprep.subr.mxu0 %v402_v19  ;;  %500 = vmatprep.subr.mxu1 %v404_v20  ;;  %v359_v3 = vld [vmem:[#allocation12 + $0x10] sm:$0xff]  ;;  %v610_v5 = vld [vmem:[#allocation13 + $0x78] sm:$0xff]  ;;  %v608_v7 = vld [vmem:[#allocation13 + $0x68] sm:$0xff] }
  0x76   :  { %430 = vmatpush1.msra.mxu0 %v401_v21  ;;  %501 = vmatpush1.msra.mxu1 %v403_v22  ;;  %v114_v4 = vld [vmem:[#allocation7] sm:$0xff]  ;;  %v607_v8 = vld [vmem:[#allocation13 + $0x60] sm:$0xff]  ;;  %v606_v9 = vld [vmem:[#allocation13 + $0x58] sm:$0xff]  ;;  %v185_v21 = vlaneseq }
  0x77   :  { %431 = vmatprep.subr.mxu0 %v398_v23  ;;  %502 = vmatprep.subr.mxu1 %v400_v24  ;;  %v609_v6 = vld [vmem:[#allocation13 + $0x70] sm:$0xff]  ;;  %v604_v11 = vld [vmem:[#allocation13 + $0x48] sm:$0xff]  ;;  %v603_v12 = vld [vmem:[#allocation13 + $0x40] sm:$0xff] }
  0x78   :  { %432 = vmatpush1.msra.mxu0 %v397_v25  ;;  %503 = vmatpush1.msra.mxu1 %v399_v26  ;;  %v605_v10 = vld [vmem:[#allocation13 + $0x50] sm:$0xff]  ;;  %v602_v13 = vld [vmem:[#allocation13 + $0x38] sm:$0xff]  ;;  %v600_v15 = vld [vmem:[#allocation13 + $0x28] sm:$0xff]  ;;  %v186_v22 = vshrl.u32 %v185_v21, 7 }
  0x79   :  { %433 = vmatprep.subr.mxu0 %v394_v27  ;;  %504 = vmatprep.subr.mxu1 %v396_v28  ;;  %v601_v14 = vld [vmem:[#allocation13 + $0x30] sm:$0xff]  ;;  %v599_v16 = vld [vmem:[#allocation13 + $0x20] sm:$0xff]  ;;  %v598_v17 = vld [vmem:[#allocation13 + $0x18] sm:$0xff] }
  0x7a   :  { %434 = vmatpush1.msra.mxu0 %v393_v29  ;;  %505 = vmatpush1.msra.mxu1 %v395_v30  ;;  %v597_v18 = vld [vmem:[#allocation13 + $0x10] sm:$0xff]  ;;  %v596_v19 = vld [vmem:[#allocation13 + $0x8] sm:$0xff]  ;;  %v595_v20 = vld [vmem:[#allocation13] sm:$0xff]  ;;  %v187_v23 = vsub.s32 0, %v186_v22  ;;  %v191_v25 = vsub.s32 1, %v186_v22 }
  0x7b   :  { %435 = vmatprep.subr.mxu0 %v390_v31  ;;  %506 = vmatprep.subr.mxu1 %v392_v32  ;;  %v183_v24 = vld [vmem:[%s1163_s5] sm:$0xf] }
  0x7c   :  { %436 = vmatpush1.msra.mxu0 %v389_v33  ;;  %507 = vmatpush1.msra.mxu1 %v391_v34  ;;  %v188_v27 = vrot.slane %v183_v24, %v187_v23  ;;  %v192_v28 = vrot.slane %v183_v24, %v191_v25 }
  0x7d   :  { %437 = vmatprep.subr.mxu0 %v386_v35  ;;  %508 = vmatprep.subr.mxu1 %v388_v36  ;;  %v199_v35 = vsub.s32 3, %v186_v22 }
  0x7e   :  { %438 = vmatpush1.msra.mxu0 %v385_v37  ;;  %509 = vmatpush1.msra.mxu1 %v387_v38 }
  0x7f   :  { %439 = vmatprep.subr.mxu0 %v382_v39  ;;  %510 = vmatprep.subr.mxu1 %v384_v40 }
  0x80   :  { %440 = vmatpush1.msra.mxu0 %v381_v41  ;;  %511 = vmatpush1.msra.mxu1 %v383_v42  ;;  %v200_v41 = vrot.slane %v183_v24, %v199_v35  ;;  %v195_v42 = vsub.s32 2, %v186_v22 }
  0x81   :  { %441 = vmatprep.subr.mxu0 %v378_v43  ;;  %512 = vmatprep.subr.mxu1 %v380_v44 }
  0x82   :  { %442 = vmatpush1.msra.mxu0 %v377_v45  ;;  %513 = vmatpush1.msra.mxu1 %v379_v46  ;;  %v196_v45 = vrot.slane %v183_v24, %v195_v42 }
  0x83   :  { %443 = vmatprep.subr.mxu0 %v374_v47  ;;  %514 = vmatprep.subr.mxu1 %v376_v48 }
  0x84   :  { %444 = vmatpush1.msra.mxu0 %v373_v49  ;;  %515 = vmatpush1.msra.mxu1 %v375_v50 }
  0x85   :  { %445 = vmatprep.subr.mxu0 %v370_v51  ;;  %516 = vmatprep.subr.mxu1 %v372_v52 }
  0x86   :  { %446 = vmatpush1.msra.mxu0 %v369_v53  ;;  %517 = vmatpush1.msra.mxu1 %v371_v54 }
  0x87   :  { %447 = vmatprep.subr.mxu0 %v366_v55  ;;  %518 = vmatprep.subr.mxu1 %v368_v56  ;;  %v116_v56 = vld [vmem:[#allocation9] sm:$0xff] }
  0x88   :  { %448 = vmatpush1.msra.mxu0 %v365_v57  ;;  %519 = vmatpush1.msra.mxu1 %v367_v58 }
  0x89   :  { %449 = vmatprep.subr.mxu0 %v362_v59  ;;  %520 = vmatprep.subr.mxu1 %v364_v60 }
  0x8a   :  { %450 = vmatpush1.msra.mxu0 %v361_v61  ;;  %521 = vmatpush1.msra.mxu1 %v363_v62 }
  0x8b   :  { %451 = vmatprep.subr.mxu0 %v358_v63  ;;  %522 = vmatprep.subr.mxu1 %v360_v1 }
  0x8c   :  { %452 = vmatpush1.msra.mxu0 %v357_v2  ;;  %485 = vmatprep.mubr.f32.mxu0 %v1038_v0 }
  0x8d   :  { %523 = vmatpush1.msra.mxu1 %v359_v3  ;;  %556 = vmatprep.mubr.f32.mxu1 %v1038_v0  ;;  %v748_v3 = vld [vmem:[%s1165_s7] ss:$0 sm:$0xff] }
  0x8e   :  { %486 = vmatmul.mubr.f32.vlgmr.msra.gmra.mxu0 %v114_v4  ;;  %557 = vmatmul.mubr.f32.vlgmr.msra.gmra.mxu1 %v114_v4 }
  0x8f   :  { %766 = vmatprep.subr.mxu0 %v1038_v0  ;;  %798 = vmatprep.mubr.msk.f32.mxu0 %vm1039_vm0, %v1038_v0 }
  0x90   :  { %767 = vmatpush3.msra.mxu0 %v610_v5 }
  0x91   :  { %768 = vmatprep.subr.mxu0 %v1038_v0 }
  0x92   :  { %769 = vmatpush3.msra.mxu0 %v609_v6 }
  0x93   :  { %770 = vmatprep.subr.mxu0 %v1038_v0 }
  0x94   :  { %771 = vmatpush3.msra.mxu0 %v608_v7 }
  0x95   :  { %772 = vmatprep.subr.mxu0 %v1038_v0 }
  0x96   :  { %773 = vmatpush3.msra.mxu0 %v607_v8 }
  0x97   :  { %774 = vmatprep.subr.mxu0 %v1038_v0 }
  0x98   :  { %775 = vmatpush3.msra.mxu0 %v606_v9 }
  0x99   :  { %776 = vmatprep.subr.mxu0 %v1038_v0 }
  0x9a   :  { %777 = vmatpush3.msra.mxu0 %v605_v10 }
  0x9b   :  { %778 = vmatprep.subr.mxu0 %v1038_v0 }
  0x9c   :  { %779 = vmatpush3.msra.mxu0 %v604_v11 }
  0x9d   :  { %780 = vmatprep.subr.mxu0 %v1038_v0 }
  0x9e   :  { %781 = vmatpush3.msra.mxu0 %v603_v12 }
  0x9f   :  { %782 = vmatprep.subr.mxu0 %v1038_v0 }
  0xa0   :  { %783 = vmatpush3.msra.mxu0 %v602_v13 }
  0xa1   :  { %784 = vmatprep.subr.mxu0 %v1038_v0 }
  0xa2   :  { %785 = vmatpush3.msra.mxu0 %v601_v14 }
  0xa3   :  { %786 = vmatprep.subr.mxu0 %v1038_v0 }
  0xa4   :  { %787 = vmatpush3.msra.mxu0 %v600_v15 }
  0xa5   :  { %788 = vmatprep.subr.mxu0 %v1038_v0 }
  0xa6   :  { %789 = vmatpush3.msra.mxu0 %v599_v16 }
  0xa7   :  { %790 = vmatprep.subr.mxu0 %v1038_v0 }
  0xa8   :  { %791 = vmatpush3.msra.mxu0 %v598_v17 }
  0xa9   :  { %792 = vmatprep.subr.mxu0 %v1038_v0 }
  0xaa   :  { %793 = vmatpush3.msra.mxu0 %v597_v18 }
  0xab   :  { %794 = vmatprep.subr.mxu0 %v1038_v0 }
  0xac   :  { %795 = vmatpush3.msra.mxu0 %v596_v19 }
  0xad   :  { %796 = vmatprep.subr.mxu0 %v1038_v0 }
  0xae   :  { %797 = vmatpush3.msra.mxu0 %v595_v20 }
 0x12c   :  { %v271_v26 = vpop.f32.mrf.mxu0 }
 0x12d   :  { %v272_v30 = vadd.f32 %v271_v26, %v188_v27  ;;  %v342_v31 = vpop.f32.mrf.mxu1 }
 0x12e   :  { %v273_v29 = vpop.f32.mrf.mxu0  ;;  %v343_v47 = vadd.f32 %v342_v31, %v196_v45 }
 0x12f   :  { %v274_v33 = vadd.f32 %v273_v29, %v192_v28  ;;  %v344_v36 = vpop.f32.mrf.mxu1 }
 0x130   :  { %v345_v44 = vadd.f32 %v344_v36, %v200_v41 }
 0x14e   :  { %v487_v32 = vpop.f32.mrf.mxu0  ;;  %v558_v39 = vpop.f32.mrf.mxu1 }
 0x14f   :  { %v563_v34 = vadd.f32 %v487_v32, %v272_v30  ;;  %v565_v50 = vadd.f32 %v558_v39, %v343_v47 }
 0x150   :  { %v489_v0 = vpop.f32.mrf.mxu0  ;;  %v560_v43 = vpop.f32.mrf.mxu1 }
 0x151   :  { %v745_v37 = vmul.f32 -1.442695, %v563_v34  ;;  %v564_v38 = vadd.f32 %v489_v0, %v274_v33  ;;  %v566_v46 = vadd.f32 %v560_v43, %v345_v44 }
 0x153   :  { %816 = vpow2.f32 %v745_v37  ;;  %v746_v40 = vmul.f32 -1.442695, %v564_v38  ;;  %v747_v48 = vmul.f32 -1.442695, %v566_v46 }
 0x155   :  { %818 = vpow2.f32 %v746_v40 }
 0x156   :  { %820 = vpow2.f32 %v747_v48 }
 0x160   :  { %v817_v49 = vpop.eup %816 }
 0x161   :  { %v570_v51 = vadd.f32 1.0, %v817_v49 }
 0x162   :  { %v819_v52 = vpop.eup %818 }
 0x163   :  { %822 = vrcp.f32 %v570_v51  ;;  %v576_v53 = vadd.f32 1.0, %v819_v52  ;;  %v821_v54 = vpop.eup %820 }
 0x164   :  { %824 = vtanh.f32 %v565_v50  ;;  %v583_v59 = vadd.f32 1.0, %v821_v54 }
 0x165   :  { %826 = vrcp.f32 %v576_v53 }
 0x166   :  { %828 = vrcp.f32 %v583_v59 }
 0x170   :  { %v823_v55 = vpop.eup %822 }
 0x171   :  { %v825_v57 = vpop.eup %824 }
 0x172   :  { %v827_v58 = vpop.eup %826  ;;  %v587_v60 = vmul.f32 %v825_v57, %v823_v55 }
 0x173   :  { %v586_v61 = vmul.f32 %v827_v58, %v116_v56  ;;  %v829_v63 = vpop.eup %828 }
 0x175   :  { %v588_v62 = vadd.f32 %v587_v60, %v586_v61 }
 0x177   :  { %593 = vst [vmem:[#allocation18] sm:$0xff] %v588_v62  ;;  %830 = vtanh.f32 %v588_v62 }
 0x184   :  { %v831_v1 = vpop.eup %830 }
 0x185   :  { %v590_v2 = vmul.f32 %v831_v1, %v829_v63 }
 0x187   :  { %799 = vmatmul.mubr.f32.vlgmr.msra.gmra.mxu0 %v590_v2  ;;  %592 = vst [vmem:[#allocation16] sm:$0xff] %v590_v2 }
 0x247   :  { %v684_v4 = vpop.f32.mrf.mxu0 }
 0x248   :  { %v685_v5 = vadd.f32 %v748_v3, %v684_v4 }
 0x249   :  { %v800_v6 = vpop.f32.mrf.mxu0 }
 0x24a   :  { %688 = vmax.xlane.f32.xlu0 %v685_v5 }
 0x2d3   :  { %v689_v7 = vpop.xlane.xlu0 %688 }
 0x2d4   :  { %v690_v8 = vsub.f32 %v685_v5, %v689_v7 }
 0x2d6   :  { %v691_v9 = vmul.f32 1.442695, %v690_v8 }
 0x2d8   :  { %832 = vpow2.f32 %v691_v9 }
 0x2e5   :  { %v833_v10 = vpop.eup %832 }
 0x2e6   :  { %693 = vadd.xlane.f32.xlu0 %v833_v10 }
 0x2e7   :  { %967 = shalt.err (!%p964_p6)
}
 0x2e8   :  { %719 = dma.vmem_to_hbm [thread:$0]  %s717_s25, 128, %s1167_s9, [#allocation17]  }
 0x2e9   :  { %s1041_s1 = smov [#allocation18]  }
 0x2ea   :  { %s726_s28 = sshll.u32 %s1041_s1, 4  ;;  %s727_s28 = int_to_ptr.vmem [resolvable:$true] %s726_s28 }
 0x2eb   :  { %s976_s29 = scalar_lea.vmem %s727_s28, 128  ;;  %p981_p8 = scmp.lt.s32.totalorder %s727_s28, %s727_s28 }
 0x2ec   :  { %p977_p7 = scmp.ne.s32.totalorder %s727_s28, %s976_s29  ;;  %p982_p9 = scmp.lt.s32.totalorder %s976_s29, %s976_s29 }
 0x2ee   :  { %p983_p10 = por %p982_p9, %p981_p8 }
 0x2f0   :  { %p984_p11 = pnand %p983_p10, %p977_p7 }
 0x2f2   :  { %987 = shalt.err (!%p984_p11)
}
 0x2f3   :  { %729 = dma.vmem_to_hbm [thread:$0]  %s727_s28, 128, %s1168_s10, [#allocation17]  }
 0x2f4   :  { %s1042_s3 = smov [#allocation15]  }
 0x2f5   :  { %s706_s9 = sshll.u32 %s1042_s3, 4  ;;  %s707_s9 = int_to_ptr.vmem [resolvable:$true] %s706_s9 }
 0x2f6   :  { %s996_s12 = scalar_lea.vmem %s707_s9, 128  ;;  %p1001_p13 = scmp.lt.s32.totalorder %s707_s9, %s707_s9 }
 0x2f7   :  { %p997_p12 = scmp.ne.s32.totalorder %s707_s9, %s996_s12  ;;  %p1002_p0 = scmp.lt.s32.totalorder %s996_s12, %s996_s12 }
 0x2f9   :  { %p1003_p1 = por %p1002_p0, %p1001_p13 }
 0x2fb   :  { %p1004_p2 = pnand %p1003_p1, %p997_p12 }
 0x36f   :  { %v694_v11 = vpop.xlane.xlu0 %693 }
 0x370   :  { %834 = vlog2.f32 %v694_v11 }
 0x37d   :  { %v835_v12 = vpop.eup %834 }
 0x37e   :  { %v696_v13 = vmul.f32 0.6931472, %v835_v12 }
 0x380   :  { %v697_v14 = vadd.f32 %v696_v13, %v689_v7 }
 0x382   :  { %v698_v15 = vsub.f32 %v685_v5, %v697_v14 }
 0x384   :  { %699 = vst [vmem:[#allocation15] sm:$0xff] %v698_v15 }
 0x385   :  { %1007 = shalt.err (!%p1004_p2)
}
 0x386   :  { %709 = dma.vmem_to_hbm [thread:$0]  %s707_s9, 128, %s1166_s8, [#allocation6]  }
 0x387   :  { %1024 = dma.done.wait [#allocation6], 128  }
 0x388   :  { %1025 = vsyncadd [#allocation6], 4294967168 }
 0x389   :  { %1026 = dma.done.wait [#allocation17], 256  }
 0x38a   :  { %1027 = vsyncadd [#allocation17], 4294967040 }
 0x38b   :  { %739 = vsyncpa [#allocation5], 1 }
 0x38c   :  { %740 = vsyncpa [#allocation8], 1 }
 0x38d   :  { %741 = vsyncpa [#allocation11], 1 }
 0x38e   :  { %742 = vsyncpa [#allocation14], 1 }
 0x38f   :  { %743 = vsyncpa [#allocation6], 1 }
 0x390   :  { %744 = vsyncpa [#allocation17], 1 }

</bundles_post_ra>
